<compile_context>
chip_gen: v7x
topology: tpu7x:2x2x1
jax: 0.10.0
libtpu: 0.0.40
codegen_flags: <defaults>
</compile_context>

<pallas_src>
import functools

import jax
import jax.numpy as jnp
from jax.experimental import pallas as pl
from jax.experimental.pallas import tpu as pltpu

STRETCH_L = -0.1
STRETCH_R = 1.1

LANE = 128
ROW_ALIGN = 16          # bf16 sublane packing -> keep row tiles multiples of 16
_EPS = 1e-6


def _round_up(x, m):
    return ((x + m - 1) // m) * m


def _pad2(x, rows, cols, fill=0.0):
    r, c = x.shape
    if r == rows and c == cols:
        return x
    return jnp.pad(x, ((0, rows - r), (0, cols - c)), constant_values=fill)


def kuma_msd_kernel(x_ref, wfc_ref, bfc_ref, whead_ref, bhead_ref, u_ref,
                    out_ref, *, num_tags_p):
    # TODO(synk): external `self.encoder` is not defined in the module; treated as identity.
    # Hoist bias reads once (JAX does not CSE broadcast_in_dim).
    b_fc = bfc_ref[...]
    b_head = bhead_ref[...]

    h = x_ref[...]                                          # bf16 row tile

    # logits = relu(fc(h)) : bf16 x bf16 MXU, f32 accumulate.
    logits = jnp.maximum(
        jnp.dot(h, wfc_ref[...], preferred_element_type=jnp.float32) + b_fc,
        0.0,
    )

    # Fused ai|bi head: one matmul; cols [0:T) = ai head, [T:2T) = bi head.
    # The -5 constant is already folded into the bi half of b_head.
    head = jnp.dot(logits.astype(jnp.bfloat16), whead_ref[...],
                   preferred_element_type=jnp.float32) + b_head
    ai = 0.1 + jax.nn.sigmoid(head[:, :num_tags_p]) * 0.8    # in (0.1, 0.9)
    bi = 1.0 + jax.nn.sigmoid(head[:, num_tags_p:]) * 5.0    # in (1, 6)

    # Kumaraswamy(ka=ai/bi, kb=(1-ai)/bi): inverse CDF needs only 1/ka, 1/kb.
    # approx EUP reciprocal + one Newton step (VPU) ~ f32-exact, no divides.
    one_m_ai = 1.0 - ai
    r_a = pl.reciprocal(ai, approx=True)
    r_a = r_a * (2.0 - ai * r_a)
    r_b = pl.reciprocal(one_m_ai, approx=True)
    r_b = r_b * (2.0 - one_m_ai * r_b)
    inv_ka = bi * r_a
    inv_kb = bi * r_b

    # Clip u away from {0,1}; xk = (1 - (1-u)^(1/kb))^(1/ka) via explicit
    # exp/log powers; clamp the base so rounding can never produce NaN.
    u = jnp.clip(u_ref[...], _EPS, 1.0 - _EPS)
    t1 = jnp.exp(jnp.log(1.0 - u) * inv_kb)
    base = jnp.maximum(1.0 - t1, 1e-38)
    xk = jnp.exp(jnp.log(base) * inv_ka)

    # HardKumaraswamy: stretch to (STRETCH_L, STRETCH_R), hard-rectify to [0,1].
    sample = jnp.clip(STRETCH_L + (STRETCH_R - STRETCH_L) * xk, 0.0, 1.0)

    # Single lane-dense fused store: [sample | ai | bi].
    out_ref[...] = jnp.concatenate([sample, ai, bi], axis=-1)


def init_params(key, input_dim, h_dim, num_tags):
    """Deterministic nn.Linear-style init (uniform +/- 1/sqrt(fan_in))."""
    ks = jax.random.split(key, 6)

    def linear(kw, kb, fan_in, fan_out):
        bound = 1.0 / (fan_in ** 0.5)
        w = jax.random.uniform(kw, (fan_in, fan_out), jnp.float32, -bound, bound)
        b = jax.random.uniform(kb, (1, fan_out), jnp.float32, -bound, bound)
        return w, b

    w_fc, b_fc = linear(ks[0], ks[1], input_dim, h_dim)
    w_ai, b_ai = linear(ks[2], ks[3], h_dim, num_tags)
    w_bi, b_bi = linear(ks[4], ks[5], h_dim, num_tags)
    return dict(w_fc=w_fc, b_fc=b_fc, w_ai=w_ai, b_ai=b_ai, w_bi=w_bi, b_bi=b_bi)


def kuma_msd_forward(x, params, u, *, tile_n=None):
    """Returns (sample, ai, bi), each of shape (N, num_tags)."""
    N, input_dim = x.shape
    h_dim = params["w_fc"].shape[1]
    num_tags = params["w_ai"].shape[1]

    # Feature dims padded to lane multiples.
    input_dim_p = _round_up(input_dim, LANE)
    h_dim_p = _round_up(h_dim, LANE)
    num_tags_p = _round_up(num_tags, LANE)

    # ---- generation-aware VMEM budget & tile size --------------------------
    try:
        vmem_cap = int(pltpu.get_tpu_info().vmem_capacity_bytes)
    except Exception:
        vmem_cap = 64 << 20   # conservative (v7x-sized) fallback

    # Per-row bytes: streamed tiles (x bf16, u f32, fused out f32) x 2 buffers
    # + in-kernel intermediates (logits f32+bf16, head, ~8 elementwise temps).
    stream_row = 2 * input_dim_p + 4 * num_tags_p + 12 * num_tags_p
    interm_row = 6 * h_dim_p + 8 * num_tags_p + 32 * num_tags_p
    per_row = 2 * stream_row + interm_row
    # bf16 weights + f32 biases (x2 to also cover the non-Buffered(1) fallback).
    weight_bytes = (2 * (input_dim_p * h_dim_p + h_dim_p * 2 * num_tags_p)
                    + 4 * (h_dim_p + 2 * num_tags_p))

    n_su = _round_up(N, ROW_ALIGN)
    if tile_n is None:
        budget = int(0.7 * vmem_cap)
        tile_cap = 1024 if vmem_cap <= (64 << 20) else 2048
        tile_n = max(ROW_ALIGN, (budget - 2 * weight_bytes) // per_row)
        tile_n = min((tile_n // ROW_ALIGN) * ROW_ALIGN, tile_cap)
    tile_n = max(ROW_ALIGN, _round_up(tile_n, ROW_ALIGN))
    tile_n = min(tile_n, n_su)
    if tile_n >= n_su and n_su >= 2 * ROW_ALIGN:
        # At least 2 grid steps so both TensorCores get work on v7x megacore.
        tile_n = _round_up((n_su + 1) // 2, ROW_ALIGN)
    n_pad = _round_up(N, tile_n)

    vmem_limit = 2 * weight_bytes + tile_n * per_row + (4 << 20)
    vmem_limit = min(max(vmem_limit, 16 << 20), int(0.9 * vmem_cap))

    # ---- operand packing (skip pads when already aligned) ------------------
    x_p = x.astype(jnp.bfloat16)
    if x_p.shape != (n_pad, input_dim_p):
        x_p = jnp.pad(x_p, ((0, n_pad - N), (0, input_dim_p - input_dim)))
    u_p = u.astype(jnp.float32)
    if u_p.shape != (n_pad, num_tags_p):
        u_p = jnp.pad(u_p, ((0, n_pad - N), (0, num_tags_p - num_tags)),
                      constant_values=0.5)

    w_fc_b = _pad2(params["w_fc"], input_dim_p, h_dim_p).astype(jnp.bfloat16)
    b_fc_p = _pad2(params["b_fc"], 1, h_dim_p)

    # Fused head weight/bias: [ai head | bi head], each padded to num_tags_p lanes.
    w_head = jnp.zeros((h_dim_p, 2 * num_tags_p), jnp.float32)
    w_head = w_head.at[:h_dim, :num_tags].set(params["w_ai"])
    w_head = w_head.at[:h_dim, num_tags_p:num_tags_p + num_tags].set(params["w_bi"])
    w_head_b = w_head.astype(jnp.bfloat16)
    b_head_p = jnp.zeros((1, 2 * num_tags_p), jnp.float32)
    b_head_p = b_head_p.at[:, :num_tags].set(params["b_ai"])
    # Fold the constant -5 into the bi-head bias.
    b_head_p = b_head_p.at[:, num_tags_p:num_tags_p + num_tags].set(
        params["b_bi"] - 5.0)

    kernel = functools.partial(kuma_msd_kernel, num_tags_p=num_tags_p)
    grid = (n_pad // tile_n,)

    def run(single_buffer_weights):
        def row_spec(cols):
            return pl.BlockSpec((tile_n, cols), lambda i: (i, 0))

        def resident(shape):
            if single_buffer_weights:
                # Constant index_map -> a single pipeline buffer is enough.
                return pl.BlockSpec(shape, lambda i: (0, 0),
                                    pipeline_mode=pl.Buffered(1))
            return pl.BlockSpec(shape, lambda i: (0, 0))

        fused = pl.pallas_call(
            kernel,
            out_shape=jax.ShapeDtypeStruct((n_pad, 3 * num_tags_p), jnp.float32),
            grid=grid,
            in_specs=[
                row_spec(input_dim_p),                 # x tile (bf16)
                resident((input_dim_p, h_dim_p)),      # w_fc (bf16, resident)
                resident((1, h_dim_p)),                # b_fc
                resident((h_dim_p, 2 * num_tags_p)),   # fused ai|bi weight (bf16)
                resident((1, 2 * num_tags_p)),         # fused ai|bi bias (-5 folded)
                row_spec(num_tags_p),                  # u tile
            ],
            out_specs=pl.BlockSpec((tile_n, 3 * num_tags_p), lambda i: (i, 0)),
            compiler_params=pltpu.CompilerParams(
                dimension_semantics=("parallel",),
                vmem_limit_bytes=int(vmem_limit),
            ),
        )(x_p, w_fc_b, b_fc_p, w_head_b, b_head_p, u_p)
        return jax.block_until_ready(fused)

    try:
        fused = run(True)
    except Exception:
        # Fallback if single-buffered pipeline_mode is unsupported in this jax.
        fused = run(False)

    sample = fused[:N, :num_tags]
    a = fused[:N, num_tags_p:num_tags_p + num_tags]
    b = fused[:N, 2 * num_tags_p:2 * num_tags_p + num_tags]
    return sample, a, b


def kuma_msd_reference(x, params, u):
    """Pure-JAX f32 reference of the same forward (exact divides / pow)."""
    logits = jax.nn.relu(x @ params["w_fc"] + params["b_fc"])
    ai = 0.1 + jax.nn.sigmoid(logits @ params["w_ai"] + params["b_ai"]) * 0.8
    bi = 1.0 + jax.nn.sigmoid(logits @ params["w_bi"] + params["b_bi"] - 5.0) * 5.0
    ka = ai / bi
    kb = (1.0 - ai) / bi
    uc = jnp.clip(u, _EPS, 1.0 - _EPS)
    xk = jnp.power(jnp.maximum(1.0 - jnp.power(1.0 - uc, 1.0 / kb), 0.0), 1.0 / ka)
    t = STRETCH_L + (STRETCH_R - STRETCH_L) * xk
    return jnp.clip(t, 0.0, 1.0), ai, bi


if __name__ == "__main__":
    # Small shapes consistent with the module: x_t is (N, input_dim).
    N, input_dim, h_dim, num_tags = 8, 32, 32, 16

    key = jax.random.PRNGKey(0)
    kx, kp, ku = jax.random.split(key, 3)

    x = jax.random.normal(kx, (N, input_dim), dtype=jnp.float32)
    params = init_params(kp, input_dim, h_dim, num_tags)

    # Uniform noise for the reparameterized (rsample) draw.
    u = jax.random.uniform(ku, (N, num_tags), jnp.float32,
                           minval=_EPS, maxval=1.0 - _EPS)

    sample, a, b = kuma_msd_forward(x, params, u)
    jax.block_until_ready((sample, a, b))

    ref_s, ref_a, ref_b = kuma_msd_reference(x, params, u)

    assert sample.shape == (N, num_tags)
    assert a.shape == (N, num_tags) and b.shape == (N, num_tags)
    assert bool(jnp.all(jnp.isfinite(sample)))
    assert bool(jnp.all(sample >= 0.0)) and bool(jnp.all(sample <= 1.0))
    # Tolerances deliberately relaxed: matmuls use bf16 operands (f32 accumulate).
    assert bool(jnp.allclose(a, ref_a, atol=2e-2, rtol=2e-2))
    assert bool(jnp.allclose(b, ref_b, atol=2e-2, rtol=2e-2))
    assert bool(jnp.allclose(sample, ref_s, atol=5e-2, rtol=5e-2))
    print("KERNEL_OK")
</pallas_src>

<mosaic_0001>
module attributes {stable_mosaic.version = 11 : i64} {
  func.func @kuma_msd_kernel(%arg0: i32, %arg1: memref<16x128xbf16, #tpu.memory_space<vmem>>, %arg2: memref<128x128xbf16, #tpu.memory_space<vmem>>, %arg3: memref<1x128xf32, #tpu.memory_space<vmem>>, %arg4: memref<128x256xbf16, #tpu.memory_space<vmem>>, %arg5: memref<1x256xf32, #tpu.memory_space<vmem>>, %arg6: memref<16x128xf32, #tpu.memory_space<vmem>>, %arg7: memref<16x384xf32, #tpu.memory_space<vmem>>) attributes {dimension_semantics = [#tpu.dimension_semantics<parallel>], iteration_bounds = array<i64: 1>, scalar_prefetch = 0 : i64, scratch_operands = 0 : i64, tpu.core_type = #tpu.core_type<tc>, window_params = [{transform_indices = @transform_0, window_bounds = array<i64: 16, 128>}, {pipeline_mode = #tpu.pipeline_mode<synchronous>, transform_indices = @transform_1, window_bounds = array<i64: 128, 128>}, {pipeline_mode = #tpu.pipeline_mode<synchronous>, transform_indices = @transform_2, window_bounds = array<i64: 1, 128>}, {pipeline_mode = #tpu.pipeline_mode<synchronous>, transform_indices = @transform_3, window_bounds = array<i64: 128, 256>}, {pipeline_mode = #tpu.pipeline_mode<synchronous>, transform_indices = @transform_4, window_bounds = array<i64: 1, 256>}, {transform_indices = @transform_5, window_bounds = array<i64: 16, 128>}, {transform_indices = @transform_6, window_bounds = array<i64: 16, 384>}]} {
    %c0 = arith.constant 0 : index
    %c0_0 = arith.constant 0 : index
    %0 = vector.load %arg3[%c0, %c0_0] : memref<1x128xf32, #tpu.memory_space<vmem>>, vector<1x128xf32>
    %c0_1 = arith.constant 0 : index
    %c0_2 = arith.constant 0 : index
    %1 = vector.load %arg5[%c0_1, %c0_2] : memref<1x256xf32, #tpu.memory_space<vmem>>, vector<1x256xf32>
    %c0_3 = arith.constant 0 : index
    %c0_4 = arith.constant 0 : index
    %2 = vector.load %arg1[%c0_3, %c0_4] : memref<16x128xbf16, #tpu.memory_space<vmem>>, vector<16x128xbf16>
    %c0_5 = arith.constant 0 : index
    %c0_6 = arith.constant 0 : index
    %3 = vector.load %arg2[%c0_5, %c0_6] : memref<128x128xbf16, #tpu.memory_space<vmem>>, vector<128x128xbf16>
    %cst = arith.constant dense<0.000000e+00> : vector<16x128xf32>
    %4 = tpu.matmul %2, %3, %cst {dimension_numbers = #tpu.dot_dimension_numbers<[1], [0], [0], [1], [0, 0, 1, 1], [], []>} : vector<16x128xbf16>, vector<128x128xbf16>, vector<16x128xf32> -> vector<16x128xf32>
    %5 = vector.broadcast %0 : vector<1x128xf32> to vector<16x128xf32>
    %6 = arith.addf %4, %5 : vector<16x128xf32>
    %cst_7 = arith.constant 0.000000e+00 : f32
    %7 = vector.broadcast %cst_7 : f32 to vector<16x128xf32>
    %8 = arith.maximumf %6, %7 : vector<16x128xf32>
    %9 = arith.truncf %8 : vector<16x128xf32> to vector<16x128xbf16>
    %c0_8 = arith.constant 0 : index
    %c0_9 = arith.constant 0 : index
    %10 = vector.load %arg4[%c0_8, %c0_9] : memref<128x256xbf16, #tpu.memory_space<vmem>>, vector<128x256xbf16>
    %cst_10 = arith.constant dense<0.000000e+00> : vector<16x256xf32>
    %11 = tpu.matmul %9, %10, %cst_10 {dimension_numbers = #tpu.dot_dimension_numbers<[1], [0], [0], [1], [0, 0, 1, 1], [], []>} : vector<16x128xbf16>, vector<128x256xbf16>, vector<16x256xf32> -> vector<16x256xf32>
    %12 = vector.broadcast %1 : vector<1x256xf32> to vector<16x256xf32>
    %13 = arith.addf %11, %12 : vector<16x256xf32>
    %14 = vector.extract_strided_slice %13 {offsets = [0, 0], sizes = [16, 128], strides = [1, 1]} : vector<16x256xf32> to vector<16x128xf32>
    %15 = arith.negf %14 : vector<16x128xf32>
    %16 = math.exp %15 : vector<16x128xf32>
    %cst_11 = arith.constant 1.000000e+00 : f32
    %17 = vector.broadcast %cst_11 : f32 to vector<16x128xf32>
    %18 = arith.addf %17, %16 : vector<16x128xf32>
    %19 = arith.divf %17, %18 : vector<16x128xf32>
    %cst_12 = arith.constant 8.000000e-01 : f32
    %20 = vector.broadcast %cst_12 : f32 to vector<16x128xf32>
    %21 = arith.mulf %19, %20 : vector<16x128xf32>
    %cst_13 = arith.constant 1.000000e-01 : f32
    %22 = vector.broadcast %cst_13 : f32 to vector<16x128xf32>
    %23 = arith.addf %22, %21 : vector<16x128xf32>
    %24 = vector.extract_strided_slice %13 {offsets = [0, 128], sizes = [16, 128], strides = [1, 1]} : vector<16x256xf32> to vector<16x128xf32>
    %25 = arith.negf %24 : vector<16x128xf32>
    %26 = math.exp %25 : vector<16x128xf32>
    %cst_14 = arith.constant 1.000000e+00 : f32
    %27 = vector.broadcast %cst_14 : f32 to vector<16x128xf32>
    %28 = arith.addf %27, %26 : vector<16x128xf32>
    %29 = arith.divf %27, %28 : vector<16x128xf32>
    %cst_15 = arith.constant 5.000000e+00 : f32
    %30 = vector.broadcast %cst_15 : f32 to vector<16x128xf32>
    %31 = arith.mulf %29, %30 : vector<16x128xf32>
    %cst_16 = arith.constant 1.000000e+00 : f32
    %32 = vector.broadcast %cst_16 : f32 to vector<16x128xf32>
    %33 = arith.addf %32, %31 : vector<16x128xf32>
    %cst_17 = arith.constant 1.000000e+00 : f32
    %34 = vector.broadcast %cst_17 : f32 to vector<16x128xf32>
    %35 = arith.subf %34, %23 : vector<16x128xf32>
    %36 = tpu.reciprocal %23 {approx = true} : vector<16x128xf32> -> vector<16x128xf32>
    %37 = arith.mulf %23, %36 : vector<16x128xf32>
    %cst_18 = arith.constant 2.000000e+00 : f32
    %38 = vector.broadcast %cst_18 : f32 to vector<16x128xf32>
    %39 = arith.subf %38, %37 : vector<16x128xf32>
    %40 = arith.mulf %36, %39 : vector<16x128xf32>
    %41 = tpu.reciprocal %35 {approx = true} : vector<16x128xf32> -> vector<16x128xf32>
    %42 = arith.mulf %35, %41 : vector<16x128xf32>
    %cst_19 = arith.constant 2.000000e+00 : f32
    %43 = vector.broadcast %cst_19 : f32 to vector<16x128xf32>
    %44 = arith.subf %43, %42 : vector<16x128xf32>
    %45 = arith.mulf %41, %44 : vector<16x128xf32>
    %46 = arith.mulf %33, %40 : vector<16x128xf32>
    %47 = arith.mulf %33, %45 : vector<16x128xf32>
    %c0_20 = arith.constant 0 : index
    %c0_21 = arith.constant 0 : index
    %48 = vector.load %arg6[%c0_20, %c0_21] : memref<16x128xf32, #tpu.memory_space<vmem>>, vector<16x128xf32>
    %cst_22 = arith.constant 9.99999997E-7 : f32
    %cst_23 = arith.constant 0.999998986 : f32
    %49 = vector.broadcast %cst_22 : f32 to vector<16x128xf32>
    %50 = arith.maximumf %49, %48 : vector<16x128xf32>
    %51 = vector.broadcast %cst_23 : f32 to vector<16x128xf32>
    %52 = arith.minimumf %51, %50 : vector<16x128xf32>
    %cst_24 = arith.constant 1.000000e+00 : f32
    %53 = vector.broadcast %cst_24 : f32 to vector<16x128xf32>
    %54 = arith.subf %53, %52 : vector<16x128xf32>
    %55 = math.log %54 : vector<16x128xf32>
    %56 = arith.mulf %55, %47 : vector<16x128xf32>
    %57 = math.exp %56 : vector<16x128xf32>
    %cst_25 = arith.constant 1.000000e+00 : f32
    %58 = vector.broadcast %cst_25 : f32 to vector<16x128xf32>
    %59 = arith.subf %58, %57 : vector<16x128xf32>
    %cst_26 = arith.constant 9.99999935E-39 : f32
    %60 = vector.broadcast %cst_26 : f32 to vector<16x128xf32>
    %61 = arith.maximumf %59, %60 : vector<16x128xf32>
    %62 = math.log %61 : vector<16x128xf32>
    %63 = arith.mulf %62, %46 : vector<16x128xf32>
    %64 = math.exp %63 : vector<16x128xf32>
    %cst_27 = arith.constant 1.200000e+00 : f32
    %65 = vector.broadcast %cst_27 : f32 to vector<16x128xf32>
    %66 = arith.mulf %65, %64 : vector<16x128xf32>
    %cst_28 = arith.constant -1.000000e-01 : f32
    %67 = vector.broadcast %cst_28 : f32 to vector<16x128xf32>
    %68 = arith.addf %67, %66 : vector<16x128xf32>
    %cst_29 = arith.constant 0.000000e+00 : f32
    %cst_30 = arith.constant 1.000000e+00 : f32
    %69 = vector.broadcast %cst_29 : f32 to vector<16x128xf32>
    %70 = arith.maximumf %69, %68 : vector<16x128xf32>
    %71 = vector.broadcast %cst_30 : f32 to vector<16x128xf32>
    %72 = arith.minimumf %71, %70 : vector<16x128xf32>
    %73 = tpu.concatenate %72, %23, %33 in 1 : vector<16x128xf32>, vector<16x128xf32>, vector<16x128xf32> -> vector<16x384xf32>
    %c0_31 = arith.constant 0 : index
    %c0_32 = arith.constant 0 : index
    %74 = vector.load %arg7[%c0_31, %c0_32] : memref<16x384xf32, #tpu.memory_space<vmem>>, vector<16x384xf32>
    tpu.vector_store %arg7[%c0_31, %c0_32], %73 {strides = array<i32>} : memref<16x384xf32, #tpu.memory_space<vmem>>, vector<16x384xf32>,
    return
  }
  func.func @transform_0(%arg0: i32) -> (i32, i32) {
    %c0_i32 = arith.constant 0 : i32
    %c0_i32_0 = arith.constant 0 : i32
    return %arg0, %c0_i32 : i32, i32
  }
  func.func @transform_1(%arg0: i32) -> (i32, i32) {
    %c0_i32 = arith.constant 0 : i32
    %c0_i32_0 = arith.constant 0 : i32
    %c0_i32_1 = arith.constant 0 : i32
    return %c0_i32, %c0_i32_0 : i32, i32
  }
  func.func @transform_2(%arg0: i32) -> (i32, i32) {
    %c0_i32 = arith.constant 0 : i32
    %c0_i32_0 = arith.constant 0 : i32
    %c0_i32_1 = arith.constant 0 : i32
    return %c0_i32, %c0_i32_0 : i32, i32
  }
  func.func @transform_3(%arg0: i32) -> (i32, i32) {
    %c0_i32 = arith.constant 0 : i32
    %c0_i32_0 = arith.constant 0 : i32
    %c0_i32_1 = arith.constant 0 : i32
    return %c0_i32, %c0_i32_0 : i32, i32
  }
  func.func @transform_4(%arg0: i32) -> (i32, i32) {
    %c0_i32 = arith.constant 0 : i32
    %c0_i32_0 = arith.constant 0 : i32
    %c0_i32_1 = arith.constant 0 : i32
    return %c0_i32, %c0_i32_0 : i32, i32
  }
  func.func @transform_5(%arg0: i32) -> (i32, i32) {
    %c0_i32 = arith.constant 0 : i32
    %c0_i32_0 = arith.constant 0 : i32
    return %arg0, %c0_i32 : i32, i32
  }
  func.func @transform_6(%arg0: i32) -> (i32, i32) {
    %c0_i32 = arith.constant 0 : i32
    %c0_i32_0 = arith.constant 0 : i32
    return %arg0, %c0_i32 : i32, i32
  }
}

module attributes {stable_mosaic.version = 11 : i64} {
  func.func @kuma_msd_kernel(%arg0: i32, %arg1: memref<16x128xbf16, #tpu.memory_space<vmem>>, %arg2: memref<128x128xbf16, #tpu.memory_space<vmem>>, %arg3: memref<1x128xf32, #tpu.memory_space<vmem>>, %arg4: memref<128x256xbf16, #tpu.memory_space<vmem>>, %arg5: memref<1x256xf32, #tpu.memory_space<vmem>>, %arg6: memref<16x128xf32, #tpu.memory_space<vmem>>, %arg7: memref<16x384xf32, #tpu.memory_space<vmem>>) attributes {dimension_semantics = [#tpu.dimension_semantics<parallel>], iteration_bounds = array<i64: 1>, scalar_prefetch = 0 : i64, scratch_operands = 0 : i64, tpu.core_type = #tpu.core_type<tc>, window_params = [{transform_indices = @transform_0, window_bounds = array<i64: 16, 128>}, {pipeline_mode = #tpu.pipeline_mode<synchronous>, transform_indices = @transform_1, window_bounds = array<i64: 128, 128>}, {pipeline_mode = #tpu.pipeline_mode<synchronous>, transform_indices = @transform_2, window_bounds = array<i64: 1, 128>}, {pipeline_mode = #tpu.pipeline_mode<synchronous>, transform_indices = @transform_3, window_bounds = array<i64: 128, 256>}, {pipeline_mode = #tpu.pipeline_mode<synchronous>, transform_indices = @transform_4, window_bounds = array<i64: 1, 256>}, {transform_indices = @transform_5, window_bounds = array<i64: 16, 128>}, {transform_indices = @transform_6, window_bounds = array<i64: 16, 384>}]} {
    %c0 = arith.constant 0 : index
    %c0_0 = arith.constant 0 : index
    %0 = vector.load %arg3[%c0, %c0_0] : memref<1x128xf32, #tpu.memory_space<vmem>>, vector<1x128xf32>
    %c0_1 = arith.constant 0 : index
    %c0_2 = arith.constant 0 : index
    %1 = vector.load %arg5[%c0_1, %c0_2] : memref<1x256xf32, #tpu.memory_space<vmem>>, vector<1x256xf32>
    %c0_3 = arith.constant 0 : index
    %c0_4 = arith.constant 0 : index
    %2 = vector.load %arg1[%c0_3, %c0_4] : memref<16x128xbf16, #tpu.memory_space<vmem>>, vector<16x128xbf16>
    %c0_5 = arith.constant 0 : index
    %c0_6 = arith.constant 0 : index
    %3 = vector.load %arg2[%c0_5, %c0_6] : memref<128x128xbf16, #tpu.memory_space<vmem>>, vector<128x128xbf16>
    %cst = arith.constant dense<0.000000e+00> : vector<16x128xf32>
    %4 = tpu.matmul %2, %3, %cst {dimension_numbers = #tpu.dot_dimension_numbers<[1], [0], [0], [1], [0, 0, 1, 1], [], []>} : vector<16x128xbf16>, vector<128x128xbf16>, vector<16x128xf32> -> vector<16x128xf32>
    %5 = vector.broadcast %0 : vector<1x128xf32> to vector<16x128xf32>
    %6 = arith.addf %4, %5 : vector<16x128xf32>
    %cst_7 = arith.constant 0.000000e+00 : f32
    %7 = vector.broadcast %cst_7 : f32 to vector<16x128xf32>
    %8 = arith.maximumf %6, %7 : vector<16x128xf32>
    %9 = arith.truncf %8 : vector<16x128xf32> to vector<16x128xbf16>
    %c0_8 = arith.constant 0 : index
    %c0_9 = arith.constant 0 : index
    %10 = vector.load %arg4[%c0_8, %c0_9] : memref<128x256xbf16, #tpu.memory_space<vmem>>, vector<128x256xbf16>
    %cst_10 = arith.constant dense<0.000000e+00> : vector<16x256xf32>
    %11 = tpu.matmul %9, %10, %cst_10 {dimension_numbers = #tpu.dot_dimension_numbers<[1], [0], [0], [1], [0, 0, 1, 1], [], []>} : vector<16x128xbf16>, vector<128x256xbf16>, vector<16x256xf32> -> vector<16x256xf32>
    %12 = vector.broadcast %1 : vector<1x256xf32> to vector<16x256xf32>
    %13 = arith.addf %11, %12 : vector<16x256xf32>
    %14 = vector.extract_strided_slice %13 {offsets = [0, 0], sizes = [16, 128], strides = [1, 1]} : vector<16x256xf32> to vector<16x128xf32>
    %15 = arith.negf %14 : vector<16x128xf32>
    %16 = math.exp %15 : vector<16x128xf32>
    %cst_11 = arith.constant 1.000000e+00 : f32
    %17 = vector.broadcast %cst_11 : f32 to vector<16x128xf32>
    %18 = arith.addf %17, %16 : vector<16x128xf32>
    %19 = arith.divf %17, %18 : vector<16x128xf32>
    %cst_12 = arith.constant 8.000000e-01 : f32
    %20 = vector.broadcast %cst_12 : f32 to vector<16x128xf32>
    %21 = arith.mulf %19, %20 : vector<16x128xf32>
    %cst_13 = arith.constant 1.000000e-01 : f32
    %22 = vector.broadcast %cst_13 : f32 to vector<16x128xf32>
    %23 = arith.addf %22, %21 : vector<16x128xf32>
    %24 = vector.extract_strided_slice %13 {offsets = [0, 128], sizes = [16, 128], strides = [1, 1]} : vector<16x256xf32> to vector<16x128xf32>
    %25 = arith.negf %24 : vector<16x128xf32>
    %26 = math.exp %25 : vector<16x128xf32>
    %cst_14 = arith.constant 1.000000e+00 : f32
    %27 = vector.broadcast %cst_14 : f32 to vector<16x128xf32>
    %28 = arith.addf %27, %26 : vector<16x128xf32>
    %29 = arith.divf %27, %28 : vector<16x128xf32>
    %cst_15 = arith.constant 5.000000e+00 : f32
    %30 = vector.broadcast %cst_15 : f32 to vector<16x128xf32>
    %31 = arith.mulf %29, %30 : vector<16x128xf32>
    %cst_16 = arith.constant 1.000000e+00 : f32
    %32 = vector.broadcast %cst_16 : f32 to vector<16x128xf32>
    %33 = arith.addf %32, %31 : vector<16x128xf32>
    %cst_17 = arith.constant 1.000000e+00 : f32
    %34 = vector.broadcast %cst_17 : f32 to vector<16x128xf32>
    %35 = arith.subf %34, %23 : vector<16x128xf32>
    %36 = tpu.reciprocal %23 {approx = true} : vector<16x128xf32> -> vector<16x128xf32>
    %37 = arith.mulf %23, %36 : vector<16x128xf32>
    %cst_18 = arith.constant 2.000000e+00 : f32
    %38 = vector.broadcast %cst_18 : f32 to vector<16x128xf32>
    %39 = arith.subf %38, %37 : vector<16x128xf32>
    %40 = arith.mulf %36, %39 : vector<16x128xf32>
    %41 = tpu.reciprocal %35 {approx = true} : vector<16x128xf32> -> vector<16x128xf32>
    %42 = arith.mulf %35, %41 : vector<16x128xf32>
    %cst_19 = arith.constant 2.000000e+00 : f32
    %43 = vector.broadcast %cst_19 : f32 to vector<16x128xf32>
    %44 = arith.subf %43, %42 : vector<16x128xf32>
    %45 = arith.mulf %41, %44 : vector<16x128xf32>
    %46 = arith.mulf %33, %40 : vector<16x128xf32>
    %47 = arith.mulf %33, %45 : vector<16x128xf32>
    %c0_20 = arith.constant 0 : index
    %c0_21 = arith.constant 0 : index
    %48 = vector.load %arg6[%c0_20, %c0_21] : memref<16x128xf32, #tpu.memory_space<vmem>>, vector<16x128xf32>
    %cst_22 = arith.constant 9.99999997E-7 : f32
    %cst_23 = arith.constant 0.999998986 : f32
    %49 = vector.broadcast %cst_22 : f32 to vector<16x128xf32>
    %50 = arith.maximumf %49, %48 : vector<16x128xf32>
    %51 = vector.broadcast %cst_23 : f32 to vector<16x128xf32>
    %52 = arith.minimumf %51, %50 : vector<16x128xf32>
    %cst_24 = arith.constant 1.000000e+00 : f32
    %53 = vector.broadcast %cst_24 : f32 to vector<16x128xf32>
    %54 = arith.subf %53, %52 : vector<16x128xf32>
    %55 = math.log %54 : vector<16x128xf32>
    %56 = arith.mulf %55, %47 : vector<16x128xf32>
    %57 = math.exp %56 : vector<16x128xf32>
    %cst_25 = arith.constant 1.000000e+00 : f32
    %58 = vector.broadcast %cst_25 : f32 to vector<16x128xf32>
    %59 = arith.subf %58, %57 : vector<16x128xf32>
    %cst_26 = arith.constant 9.99999935E-39 : f32
    %60 = vector.broadcast %cst_26 : f32 to vector<16x128xf32>
    %61 = arith.maximumf %59, %60 : vector<16x128xf32>
    %62 = math.log %61 : vector<16x128xf32>
    %63 = arith.mulf %62, %46 : vector<16x128xf32>
    %64 = math.exp %63 : vector<16x128xf32>
    %cst_27 = arith.constant 1.200000e+00 : f32
    %65 = vector.broadcast %cst_27 : f32 to vector<16x128xf32>
    %66 = arith.mulf %65, %64 : vector<16x128xf32>
    %cst_28 = arith.constant -1.000000e-01 : f32
    %67 = vector.broadcast %cst_28 : f32 to vector<16x128xf32>
    %68 = arith.addf %67, %66 : vector<16x128xf32>
    %cst_29 = arith.constant 0.000000e+00 : f32
    %cst_30 = arith.constant 1.000000e+00 : f32
    %69 = vector.broadcast %cst_29 : f32 to vector<16x128xf32>
    %70 = arith.maximumf %69, %68 : vector<16x128xf32>
    %71 = vector.broadcast %cst_30 : f32 to vector<16x128xf32>
    %72 = arith.minimumf %71, %70 : vector<16x128xf32>
    %73 = tpu.concatenate %72, %23, %33 in 1 : vector<16x128xf32>, vector<16x128xf32>, vector<16x128xf32> -> vector<16x384xf32>
    %c0_31 = arith.constant 0 : index
    %c0_32 = arith.constant 0 : index
    %74 = vector.load %arg7[%c0_31, %c0_32] : memref<16x384xf32, #tpu.memory_space<vmem>>, vector<16x384xf32>
    tpu.vector_store %arg7[%c0_31, %c0_32], %73 {strides = array<i32>} : memref<16x384xf32, #tpu.memory_space<vmem>>, vector<16x384xf32>,
    return
  }
  func.func @transform_0(%arg0: i32) -> (i32, i32) {
    %c0_i32 = arith.constant 0 : i32
    %c0_i32_0 = arith.constant 0 : i32
    return %arg0, %c0_i32 : i32, i32
  }
  func.func @transform_1(%arg0: i32) -> (i32, i32) {
    %c0_i32 = arith.constant 0 : i32
    %c0_i32_0 = arith.constant 0 : i32
    %c0_i32_1 = arith.constant 0 : i32
    return %c0_i32, %c0_i32_0 : i32, i32
  }
  func.func @transform_2(%arg0: i32) -> (i32, i32) {
    %c0_i32 = arith.constant 0 : i32
    %c0_i32_0 = arith.constant 0 : i32
    %c0_i32_1 = arith.constant 0 : i32
    return %c0_i32, %c0_i32_0 : i32, i32
  }
  func.func @transform_3(%arg0: i32) -> (i32, i32) {
    %c0_i32 = arith.constant 0 : i32
    %c0_i32_0 = arith.constant 0 : i32
    %c0_i32_1 = arith.constant 0 : i32
    return %c0_i32, %c0_i32_0 : i32, i32
  }
  func.func @transform_4(%arg0: i32) -> (i32, i32) {
    %c0_i32 = arith.constant 0 : i32
    %c0_i32_0 = arith.constant 0 : i32
    %c0_i32_1 = arith.constant 0 : i32
    return %c0_i32, %c0_i32_0 : i32, i32
  }
  func.func @transform_5(%arg0: i32) -> (i32, i32) {
    %c0_i32 = arith.constant 0 : i32
    %c0_i32_0 = arith.constant 0 : i32
    return %arg0, %c0_i32 : i32, i32
  }
  func.func @transform_6(%arg0: i32) -> (i32, i32) {
    %c0_i32 = arith.constant 0 : i32
    %c0_i32_0 = arith.constant 0 : i32
    return %arg0, %c0_i32 : i32, i32
  }
}

</mosaic_0001>

<bundles_post_ra>
// kernel: tpu_custom_call.1
= control target key start
LH: loop header
LB: loop body
LE: loop exit
PB: predicated region body
PF: predicated region fallthrough
CT: control target
= control target key end

     0   :  { %11 = vsyncpa [#allocation3], 0  ;;  %s867_s0 = inlined_call_operand.hbm [shape: bf16[16,128], index: 0, kind: input, shape index: {}]   ;;  %s868_s1 = inlined_call_operand.hbm [shape: bf16[128,128], index: 1, kind: input, shape index: {}]   ;;  %s869_s2 = inlined_call_operand.hbm [shape: f32[1,128], index: 2, kind: input, shape index: {}]   ;;  %s870_s3 = inlined_call_operand.hbm [shape: bf16[128,256], index: 3, kind: input, shape index: {}]   ;;  %s871_s4 = inlined_call_operand.vmem [shape: f32[1,256], index: 4, kind: input, shape index: {}]   ;;  %s872_s5 = inlined_call_operand.vmem [shape: f32[16,128], index: 5, kind: input, shape index: {}]   ;;  %s873_s6 = inlined_call_operand.hbm [shape: f32[16,384], index: 6, kind: output, shape index: {}]  }
   0x1   :  { %12 = vsyncpa [#allocation6], 0 }
   0x2   :  { %13 = vsyncpa [#allocation9], 0 }
   0x3   :  { %14 = vsyncpa [#allocation4], 0  ;;  %s735_s21 = smov [#allocation5]   ;;  %s736_s23 = smov [#allocation2]  }
   0x4   :  { %s32_s22 = sshll.u32 %s735_s21, 4  ;;  %s20_s24 = sshll.u32 %s736_s23, 4  ;;  %s33_s22 = int_to_ptr.vmem [resolvable:$true] %s32_s22  ;;  %s784_s24 = int_to_ptr.vmem [resolvable:$true] %s20_s24 }
   0x5   :  { %s617_s27 = scalar_lea.hbm %s868_s1, 1024 }
   0x6   :  { %p618_p0 = scmp.ne.s32.totalorder %s868_s1, %s617_s27  ;;  %p621_p1 = scmp.lt.u32.totalorder %s617_s27, %s868_s1 }
   0x8   :  { %p623_p2 = pnand %p621_p1, %p618_p0 }
   0xa   :  { %626 = shalt.err (!%p623_p2)
}
   0xb   :  { %s627_s8 = scalar_lea.vmem %s33_s22, 1024  ;;  %p632_p4 = scmp.lt.s32.totalorder %s33_s22, %s33_s22 }
   0xc   :  { %p628_p3 = scmp.ne.s32.totalorder %s33_s22, %s627_s8  ;;  %p633_p5 = scmp.lt.s32.totalorder %s627_s8, %s627_s8 }
   0xe   :  { %p634_p6 = por %p633_p5, %p632_p4 }
  0x10   :  { %p635_p7 = pnand %p634_p6, %p628_p3 }
  0x12   :  { %638 = shalt.err (!%p635_p7)
}
  0x13   :  { %s737_s9 = smov 64   ;;  %s738_s10 = smov 4  }
  0x14   :  { %38 = dma.hbm_to_vmem [thread:$0]  %s868_s1, 1024, %s33_s22, [#allocation6], %s737_s9, %s737_s9, %s738_s10  }
  0x15   :  { %s639_s15 = scalar_lea.hbm %s867_s0, 128 }
  0x16   :  { %p640_p8 = scmp.ne.s32.totalorder %s867_s0, %s639_s15  ;;  %p643_p9 = scmp.lt.u32.totalorder %s639_s15, %s867_s0 }
  0x18   :  { %p645_p10 = pnand %p643_p9, %p640_p8 }
  0x1a   :  { %648 = shalt.err (!%p645_p10)
}
  0x1b   :  { %s649_s20 = scalar_lea.vmem %s784_s24, 128  ;;  %p654_p12 = scmp.lt.s32.totalorder %s784_s24, %s784_s24 }
  0x1c   :  { %p650_p11 = scmp.ne.s32.totalorder %s784_s24, %s649_s20  ;;  %p655_p13 = scmp.lt.s32.totalorder %s649_s20, %s649_s20 }
  0x1e   :  { %p656_p0 = por %p655_p13, %p654_p12 }
  0x20   :  { %p657_p1 = pnand %p656_p0, %p650_p11 }
  0x22   :  { %660 = shalt.err (!%p657_p1)
}
  0x23   :  { %26 = dma.hbm_to_vmem [thread:$0]  %s867_s0, 128, %s784_s24, [#allocation3], %s737_s9, %s737_s9, %s738_s10  }
  0x24   :  { %s739_s22 = smov [#allocation7]   ;;  %s740_s25 = smov [#allocation8]  }
  0x25   :  { %s45_s23 = sshll.u32 %s739_s22, 4  ;;  %s54_s26 = sshll.u32 %s740_s25, 4  ;;  %s46_s23 = int_to_ptr.vmem [resolvable:$true] %s45_s23  ;;  %s815_s26 = int_to_ptr.vmem [resolvable:$true] %s54_s26 }
  0x26   :  { %s661_s29 = scalar_lea.hbm %s869_s2, 16 }
  0x27   :  { %p662_p2 = scmp.ne.s32.totalorder %s869_s2, %s661_s29  ;;  %p665_p3 = scmp.lt.u32.totalorder %s661_s29, %s869_s2 }
  0x29   :  { %p667_p4 = pnand %p665_p3, %p662_p2 }
  0x2b   :  { %670 = shalt.err (!%p667_p4)
}
  0x2c   :  { %s671_s0 = scalar_lea.vmem %s46_s23, 16  ;;  %s675_s24 = scalar_lea.vmem %s46_s23, 32 }
  0x2d   :  { %p672_p5 = scmp.ne.s32.totalorder %s46_s23, %s671_s0  ;;  %p676_p6 = scmp.lt.s32.totalorder %s46_s23, %s46_s23 }
  0x2e   :  { %p677_p7 = scmp.lt.s32.totalorder %s675_s24, %s671_s0 }
  0x30   :  { %p678_p8 = por %p677_p7, %p676_p6 }
  0x32   :  { %p679_p9 = pnand %p678_p8, %p672_p5 }
  0x34   :  { %682 = shalt.err (!%p679_p9)
}
  0x35   :  { %48 = dma.hbm_to_vmem [thread:$0]  %s869_s2, 16, %s46_s23, [#allocation6]  }
  0x36   :  { %s683_s14 = scalar_lea.hbm %s870_s3, 2048 }
  0x37   :  { %p684_p10 = scmp.ne.s32.totalorder %s870_s3, %s683_s14  ;;  %p687_p11 = scmp.lt.u32.totalorder %s683_s14, %s870_s3 }
  0x39   :  { %p689_p12 = pnand %p687_p11, %p684_p10 }
  0x3b   :  { %692 = shalt.err (!%p689_p12)
}
  0x3c   :  { %s693_s19 = scalar_lea.vmem %s815_s26, 2048  ;;  %p698_p0 = scmp.lt.s32.totalorder %s815_s26, %s815_s26 }
  0x3d   :  { %p694_p13 = scmp.ne.s32.totalorder %s815_s26, %s693_s19  ;;  %p699_p1 = scmp.lt.s32.totalorder %s693_s19, %s693_s19 }
  0x3f   :  { %p700_p2 = por %p699_p1, %p698_p0 }
  0x41   :  { %p701_p3 = pnand %p700_p2, %p694_p13 }
  0x43   :  { %704 = shalt.err (!%p701_p3)
}
  0x44   :  { %s741_s2 = smov 128   ;;  %s742_s20 = smov 8  }
  0x45   :  { %60 = dma.hbm_to_vmem [thread:$0]  %s870_s3, 2048, %s815_s26, [#allocation9], %s741_s2, %s741_s2, %s742_s20  }
  0x46   :  { %727 = dma.done.wait [#allocation3], 128  }
  0x47   :  { %728 = vsyncadd [#allocation3], 4294967168 }
  0x48   :  { %729 = dma.done.wait [#allocation6], 1040  }
  0x49   :  { %730 = vsyncadd [#allocation6], 4294966256 }
  0x4a   :  { %731 = dma.done.wait [#allocation9], 2048  }
  0x4b   :  { %732 = vsyncadd [#allocation9], 4294965248  ;;  %v743_v0 = vmov 0.0   ;;  %vm744_vm0 = vmmov 0   ;;  %v544_v1 = vld [vmem:[#allocation5] sm:$0xff]   ;;  %v545_v2 = vld [vmem:[#allocation5 + $0x8] sm:$0xff]   ;;  %v219_v37 = vlaneseq }
  0x4c   :  { %510 = vmatprep.subr.bf16.mxu0 %v743_v0  ;;  %526 = vmatprep.mubr.msk.bf16.mxu0 %vm744_vm0, %v743_v0  ;;  %v546_v3 = vld [vmem:[#allocation5 + $0x10] sm:$0xff]   ;;  %v547_v4 = vld [vmem:[#allocation5 + $0x18] sm:$0xff]   ;;  %v555_v6 = vld [vmem:[#allocation8] ss:$8 sps:$4 sm:$0xff]   ;;  %v745_v26 = vmov 0  }
  0x4d   :  { %511 = vmatpush3.bf16.msra.mxu0 %v544_v1  ;;  %v553_v5 = vld [vmem:[#allocation8 + $0x4] ss:$8 sps:$4 sm:$0xff]   ;;  %v556_v7 = vld [vmem:[#allocation8 + $0x14] ss:$8 sps:$4 sm:$0xff]   ;;  %v558_v8 = vld [vmem:[#allocation8 + $0x10] ss:$8 sps:$4 sm:$0xff]   ;;  %341 = vmatprep.mubr.bf16.mxu1 %v745_v26 }
  0x4e   :  { %512 = vmatprep.subr.bf16.mxu0 %v743_v0  ;;  %309 = vmatprep.subr.bf16.mxu1 %v553_v5  ;;  %v559_v9 = vld [vmem:[#allocation8 + $0x24] ss:$8 sps:$4 sm:$0xff]   ;;  %v561_v11 = vld [vmem:[#allocation8 + $0x20] ss:$8 sps:$4 sm:$0xff]   ;;  %v562_v12 = vld [vmem:[#allocation8 + $0x34] ss:$8 sps:$4 sm:$0xff]  }
  0x4f   :  { %310 = vmatpush1.bf16.msra.mxu1 %v555_v6  ;;  %v548_v10 = vld [vmem:[#allocation5 + $0x20] sm:$0xff]   ;;  %v549_v13 = vld [vmem:[#allocation5 + $0x28] sm:$0xff]   ;;  %v564_v14 = vld [vmem:[#allocation8 + $0x30] ss:$8 sps:$4 sm:$0xff]   ;;  %v220_v38 = vshrl.u32 %v219_v37, 7 }
  0x50   :  { %311 = vmatprep.subr.bf16.mxu1 %v556_v7  ;;  %v565_v15 = vld [vmem:[#allocation8 + $0x44] ss:$8 sps:$4 sm:$0xff]   ;;  %v567_v17 = vld [vmem:[#allocation8 + $0x40] ss:$8 sps:$4 sm:$0xff]   ;;  %v568_v18 = vld [vmem:[#allocation8 + $0x54] ss:$8 sps:$4 sm:$0xff]  }
  0x51   :  { %513 = vmatpush3.bf16.msra.mxu0 %v545_v2  ;;  %v550_v16 = vld [vmem:[#allocation5 + $0x30] sm:$0xff]   ;;  %v551_v19 = vld [vmem:[#allocation5 + $0x38] sm:$0xff]   ;;  %v573_v23 = vld [vmem:[#allocation8 + $0x60] ss:$8 sps:$4 sm:$0xff]   ;;  %v221_v39 = vsub.s32 0, %v220_v38  ;;  %v225_v41 = vsub.s32 1, %v220_v38 }
  0x52   :  { %514 = vmatprep.subr.bf16.mxu0 %v743_v0  ;;  %v570_v20 = vld [vmem:[#allocation8 + $0x50] ss:$8 sps:$4 sm:$0xff]   ;;  %v571_v22 = vld [vmem:[#allocation8 + $0x64] ss:$8 sps:$4 sm:$0xff]   ;;  %v574_v24 = vld [vmem:[#allocation8 + $0x74] ss:$8 sps:$4 sm:$0xff]  }
  0x53   :  { %312 = vmatpush1.bf16.msra.mxu1 %v558_v8  ;;  %v552_v21 = vld [vmem:[#allocation2] sm:$0xff]   ;;  %v471_v27 = vld [vmem:[#allocation7] ss:$0 sm:$0xff]  ;;  %v79_v40 = vld [vmem:[%s871_s4] sm:$0x3] }
  0x54   :  { %313 = vmatprep.subr.bf16.mxu1 %v559_v9  ;;  %v576_v25 = vld [vmem:[#allocation8 + $0x70] ss:$8 sps:$4 sm:$0xff]   ;;  %v222_v42 = vrot.slane %v79_v40, %v221_v39  ;;  %v226_v43 = vrot.slane %v79_v40, %v225_v41  ;;  %v406_v63 = vld [vmem:[%s872_s5] sm:$0xff] }
  0x55   :  { %515 = vmatpush3.bf16.msra.mxu0 %v546_v3  ;;  %v408_v1 = vmax.f32 %v406_v63, 1e-06  ;;  %v407_v2 = vld [vmem:[%s872_s5 + $0x8] sm:$0xff]  ;;  %s746_s5 = smov [#allocation10]  }
  0x56   :  { %516 = vmatprep.subr.bf16.mxu0 %v743_v0  ;;  %s457_s27 = sshll.u32 %s746_s5, 4  ;;  %s458_s27 = int_to_ptr.vmem [resolvable:$true] %s457_s27 }
  0x57   :  { %314 = vmatpush1.bf16.msra.mxu1 %v561_v11  ;;  %v410_v3 = vmin.f32 %v408_v1, 0.999999  ;;  %s705_s28 = scalar_lea.vmem %s458_s27, 768  ;;  %p710_p5 = scmp.lt.s32.totalorder %s458_s27, %s458_s27 }
  0x58   :  { %315 = vmatprep.subr.bf16.mxu1 %v562_v12  ;;  %p706_p4 = scmp.ne.s32.totalorder %s458_s27, %s705_s28  ;;  %p711_p6 = scmp.lt.s32.totalorder %s705_s28, %s705_s28 }
  0x59   :  { %517 = vmatpush3.bf16.msra.mxu0 %v547_v4  ;;  %v409_v4 = vmax.f32 %v407_v2, 1e-06 }
  0x5a   :  { %518 = vmatprep.subr.bf16.mxu0 %v743_v0  ;;  %p712_p7 = por %p711_p6, %p710_p5 }
  0x5b   :  { %316 = vmatpush1.bf16.msra.mxu1 %v564_v14  ;;  %v411_v14 = vmin.f32 %v409_v4, 0.999999 }
  0x5c   :  { %317 = vmatprep.subr.bf16.mxu1 %v565_v15  ;;  %p713_p8 = pnand %p712_p7, %p706_p4 }
  0x5d   :  { %519 = vmatpush3.bf16.msra.mxu0 %v548_v10  ;;  %v412_v10 = vsub.f32 1.0, %v410_v3 }
  0x5e   :  { %520 = vmatprep.subr.bf16.mxu0 %v743_v0 }
  0x5f   :  { %318 = vmatpush1.bf16.msra.mxu1 %v567_v17 }
  0x60   :  { %319 = vmatprep.subr.bf16.mxu1 %v568_v18 }
  0x61   :  { %521 = vmatpush3.bf16.msra.mxu0 %v549_v13 }
  0x62   :  { %522 = vmatprep.subr.bf16.mxu0 %v743_v0 }
  0x63   :  { %320 = vmatpush1.bf16.msra.mxu1 %v570_v20 }
  0x64   :  { %321 = vmatprep.subr.bf16.mxu1 %v571_v22 }
  0x65   :  { %523 = vmatpush3.bf16.msra.mxu0 %v550_v16 }
  0x66   :  { %524 = vmatprep.subr.bf16.mxu0 %v743_v0 }
  0x67   :  { %322 = vmatpush1.bf16.msra.mxu1 %v573_v23 }
  0x68   :  { %323 = vmatprep.subr.bf16.mxu1 %v574_v24 }
  0x69   :  { %525 = vmatpush3.bf16.msra.mxu0 %v551_v19 }
  0x6b   :  { %324 = vmatpush1.bf16.msra.mxu1 %v576_v25 }
  0x6c   :  { %527 = vmatmul.mubr.bf16.vlgmr.msra.gmra.mrb[0].mxu0 %v552_v21  ;;  %v413_v21 = vsub.f32 1.0, %v411_v14 }
 0x13f   :  { %v192_v28 = vpop.f32.mrb[0].mxu0 }
 0x140   :  { %v193_v29 = vadd.f32 %v471_v27, %v192_v28  ;;  %v528_v30 = vpop.f32.mrb[1].mxu0 }
 0x141   :  { %v195_v31 = vpop.f32.mrb[2].mxu0 }
 0x142   :  { %v196_v32 = vadd.f32 %v471_v27, %v195_v31  ;;  %v529_v33 = vpop.f32.mrb[3].mxu0  ;;  %v199_v34 = vmax.f32 %v193_v29, 0.0 }
 0x144   :  { %v200_v35 = vmax.f32 %v196_v32, 0.0 }
 0x146   :  { %v201_v36 = vpack.c.bf16 %v200_v35, %v199_v34 }
 0x148   :  { %342 = vmatmul.mubr.bf16.vlgmr.msra.gmra.mrb[0].mxu1 %v201_v36 }
 0x21b   :  { %v343_v44 = vpop.f32.mrb[0].mxu1 }
 0x21c   :  { %v344_v45 = vadd.f32 %v343_v44, %v222_v42  ;;  %v345_v46 = vpop.f32.mrb[1].mxu1 }
 0x21d   :  { %v346_v47 = vadd.f32 %v345_v46, %v226_v43  ;;  %v347_v48 = vpop.f32.mrb[2].mxu1 }
 0x21e   :  { %v497_v49 = vmul.f32 -1.442695, %v344_v45  ;;  %v348_v50 = vadd.f32 %v347_v48, %v222_v42  ;;  %v349_v51 = vpop.f32.mrb[3].mxu1 }
 0x21f   :  { %v499_v52 = vmul.f32 -1.442695, %v346_v47  ;;  %v350_v53 = vadd.f32 %v349_v51, %v226_v43 }
 0x220   :  { %577 = vpow2.f32 %v497_v49  ;;  %v498_v54 = vmul.f32 -1.442695, %v348_v50 }
 0x221   :  { %579 = vpow2.f32 %v499_v52  ;;  %v500_v55 = vmul.f32 -1.442695, %v350_v53 }
 0x222   :  { %581 = vpow2.f32 %v498_v54 }
 0x223   :  { %583 = vpow2.f32 %v500_v55 }
 0x22a   :  { %v578_v56 = vpop.eup %577 }
 0x22b   :  { %v580_v57 = vpop.eup %579  ;;  %v358_v58 = vadd.f32 1.0, %v578_v56 }
 0x22c   :  { %v582_v59 = vpop.eup %581  ;;  %v374_v60 = vadd.f32 1.0, %v580_v57 }
 0x22d   :  { %v584_v61 = vpop.eup %583  ;;  %585 = vrcp.f32 %v358_v58  ;;  %v359_v62 = vadd.f32 1.0, %v582_v59 }
 0x22e   :  { %587 = vrcp.f32 %v374_v60  ;;  %v375_v0 = vadd.f32 1.0, %v584_v61 }
 0x22f   :  { %589 = vrcp.f32 %v359_v62 }
 0x230   :  { %591 = vrcp.f32 %v375_v0 }
 0x237   :  { %v586_v5 = vpop.eup %585 }
 0x238   :  { %v588_v6 = vpop.eup %587  ;;  %v364_v7 = vmul.f32 0.8, %v586_v5 }
 0x239   :  { %v590_v8 = vpop.eup %589  ;;  %v380_v9 = vmul.f32 5.0, %v588_v6 }
 0x23a   :  { %v592_v11 = vpop.eup %591  ;;  %v366_v12 = vadd.f32 0.1, %v364_v7  ;;  %v365_v13 = vmul.f32 0.8, %v590_v8 }
 0x23b   :  { %v382_v15 = vadd.f32 1.0, %v380_v9  ;;  %v381_v16 = vmul.f32 5.0, %v592_v11 }
 0x23c   :  { %v384_v17 = vsub.f32 1.0, %v366_v12  ;;  %593 = vrcp.f32 %v366_v12  ;;  %447 = vst [vmem:[#allocation10 + $0x8] sm:$0xff] %v366_v12  ;;  %v367_v18 = vadd.f32 0.1, %v365_v13 }
 0x23d   :  { %595 = vlog2.f32 %v412_v10  ;;  %448 = vst [vmem:[#allocation10 + $0x10] sm:$0xff] %v382_v15  ;;  %v383_v19 = vadd.f32 1.0, %v381_v16 }
 0x23e   :  { %597 = vrcp.f32 %v384_v17  ;;  %v385_v20 = vsub.f32 1.0, %v367_v18  ;;  %450 = vst [vmem:[#allocation10 + $0x20] sm:$0xff] %v367_v18 }
 0x23f   :  { %599 = vrcp.f32 %v367_v18  ;;  %451 = vst [vmem:[#allocation10 + $0x28] sm:$0xff] %v383_v19 }
 0x240   :  { %601 = vrcp.f32 %v385_v20 }
 0x241   :  { %603 = vlog2.f32 %v413_v21 }
 0x246   :  { %v594_v22 = vpop.eup %593 }
 0x247   :  { %v596_v23 = vpop.eup %595  ;;  %v388_v24 = vmul.f32 %v594_v22, %v366_v12 }
 0x248   :  { %v598_v25 = vpop.eup %597  ;;  %v415_v38 = vmul.f32 0.6931472, %v596_v23 }
 0x249   :  { %v600_v26 = vpop.eup %599  ;;  %v390_v27 = vsub.f32 2.0, %v388_v24  ;;  %v396_v28 = vmul.f32 %v598_v25, %v384_v17 }
 0x24a   :  { %v602_v29 = vpop.eup %601  ;;  %v389_v30 = vmul.f32 %v600_v26, %v367_v18 }
 0x24b   :  { %v392_v31 = vmul.f32 %v594_v22, %v390_v27  ;;  %v398_v32 = vsub.f32 2.0, %v396_v28  ;;  %v397_v33 = vmul.f32 %v602_v29, %v385_v20  ;;  %v604_v34 = vpop.eup %603 }
 0x24c   :  { %v391_v35 = vsub.f32 2.0, %v389_v30  ;;  %v417_v43 = vmul.f32 0.6931472, %v604_v34 }
 0x24d   :  { %v400_v36 = vmul.f32 %v598_v25, %v398_v32  ;;  %v402_v37 = vmul.f32 %v392_v31, %v382_v15  ;;  %v399_v39 = vsub.f32 2.0, %v397_v33 }
 0x24e   :  { %v393_v40 = vmul.f32 %v600_v26, %v391_v35 }
 0x24f   :  { %v404_v41 = vmul.f32 %v400_v36, %v382_v15  ;;  %v401_v42 = vmul.f32 %v602_v29, %v399_v39 }
 0x250   :  { %v403_v44 = vmul.f32 %v393_v40, %v383_v19 }
 0x251   :  { %v418_v45 = vmul.f32 %v415_v38, %v404_v41  ;;  %v405_v46 = vmul.f32 %v401_v42, %v383_v19 }
 0x253   :  { %v420_v47 = vmul.f32 1.442695, %v418_v45  ;;  %v419_v48 = vmul.f32 %v417_v43, %v405_v46 }
 0x255   :  { %605 = vpow2.f32 %v420_v47  ;;  %v422_v49 = vmul.f32 1.442695, %v419_v48 }
 0x257   :  { %607 = vpow2.f32 %v422_v49 }
 0x25f   :  { %v606_v50 = vpop.eup %605 }
 0x260   :  { %v424_v51 = vsub.f32 1.0, %v606_v50 }
 0x261   :  { %v608_v52 = vpop.eup %607 }
 0x262   :  { %v426_v53 = vmax.f32 %v424_v51, 1e-38  ;;  %v425_v54 = vsub.f32 1.0, %v608_v52 }
 0x264   :  { %609 = vlog2.f32 %v426_v53  ;;  %v427_v55 = vmax.f32 %v425_v54, 1e-38 }
 0x266   :  { %611 = vlog2.f32 %v427_v55 }
 0x26e   :  { %v610_v56 = vpop.eup %609 }
 0x26f   :  { %v429_v57 = vmul.f32 0.6931472, %v610_v56 }
 0x270   :  { %v612_v58 = vpop.eup %611 }
 0x271   :  { %v432_v59 = vmul.f32 %v429_v57, %v402_v37  ;;  %v431_v60 = vmul.f32 0.6931472, %v612_v58 }
 0x273   :  { %v434_v61 = vmul.f32 1.442695, %v432_v59  ;;  %v433_v62 = vmul.f32 %v431_v60, %v403_v44 }
 0x275   :  { %613 = vpow2.f32 %v434_v61  ;;  %v436_v63 = vmul.f32 1.442695, %v433_v62 }
 0x277   :  { %615 = vpow2.f32 %v436_v63 }
 0x27f   :  { %v614_v0 = vpop.eup %613 }
 0x280   :  { %v438_v1 = vmul.f32 1.2, %v614_v0 }
 0x281   :  { %v616_v2 = vpop.eup %615 }
 0x282   :  { %v440_v3 = vadd.f32 -0.1, %v438_v1  ;;  %v439_v4 = vmul.f32 1.2, %v616_v2 }
 0x284   :  { %v442_v5 = vmax.f32 %v440_v3, 0.0  ;;  %v441_v6 = vadd.f32 -0.1, %v439_v4 }
 0x286   :  { %v444_v7 = vmin.f32 %v442_v5, 1.0  ;;  %v443_v8 = vmax.f32 %v441_v6, 0.0 }
 0x288   :  { %446 = vst [vmem:[#allocation10] sm:$0xff] %v444_v7  ;;  %v445_v9 = vmin.f32 %v443_v8, 1.0 }
 0x28a   :  { %449 = vst [vmem:[#allocation10 + $0x18] sm:$0xff] %v445_v9 }
 0x28b   :  { %716 = shalt.err (!%p713_p8)
}
 0x28c   :  { %s717_s7 = scalar_lea.hbm %s873_s6, 768 }
 0x28d   :  { %p718_p9 = scmp.ne.s32.totalorder %s873_s6, %s717_s7  ;;  %p721_p10 = scmp.lt.u32.totalorder %s717_s7, %s873_s6 }
 0x28f   :  { %p723_p11 = pnand %p721_p10, %p718_p9 }
 0x291   :  { %726 = shalt.err (!%p723_p11)
}
 0x292   :  { %s747_s9 = smov 384   ;;  %s748_s10 = smov 24  }
 0x293   :  { %463 = dma.vmem_to_hbm [thread:$0]  %s458_s27, 768, %s873_s6, [#allocation4], %s747_s9, %s747_s9, %s748_s10  }
 0x294   :  { %733 = dma.done.wait [#allocation4], 768  }
 0x295   :  { %734 = vsyncadd [#allocation4], 4294966528 }
 0x296   :  { %467 = vsyncpa [#allocation3], 1 }
 0x297   :  { %468 = vsyncpa [#allocation6], 1 }
 0x298   :  { %469 = vsyncpa [#allocation9], 1 }
 0x299   :  { %470 = vsyncpa [#allocation4], 1 }

// kernel: tpu_custom_call.1
= control target key start
LH: loop header
LB: loop body
LE: loop exit
PB: predicated region body
PF: predicated region fallthrough
CT: control target
= control target key end

     0   :  { %11 = vsyncpa [#allocation3], 0  ;;  %s867_s0 = inlined_call_operand.hbm [shape: bf16[16,128], index: 0, kind: input, shape index: {}]   ;;  %s868_s1 = inlined_call_operand.hbm [shape: bf16[128,128], index: 1, kind: input, shape index: {}]   ;;  %s869_s2 = inlined_call_operand.hbm [shape: f32[1,128], index: 2, kind: input, shape index: {}]   ;;  %s870_s3 = inlined_call_operand.hbm [shape: bf16[128,256], index: 3, kind: input, shape index: {}]   ;;  %s871_s4 = inlined_call_operand.vmem [shape: f32[1,256], index: 4, kind: input, shape index: {}]   ;;  %s872_s5 = inlined_call_operand.vmem [shape: f32[16,128], index: 5, kind: input, shape index: {}]   ;;  %s873_s6 = inlined_call_operand.hbm [shape: f32[16,384], index: 6, kind: output, shape index: {}]  }
   0x1   :  { %12 = vsyncpa [#allocation6], 0 }
   0x2   :  { %13 = vsyncpa [#allocation9], 0 }
   0x3   :  { %14 = vsyncpa [#allocation4], 0  ;;  %s735_s21 = smov [#allocation5]   ;;  %s736_s23 = smov [#allocation2]  }
   0x4   :  { %s32_s22 = sshll.u32 %s735_s21, 4  ;;  %s20_s24 = sshll.u32 %s736_s23, 4  ;;  %s33_s22 = int_to_ptr.vmem [resolvable:$true] %s32_s22  ;;  %s784_s24 = int_to_ptr.vmem [resolvable:$true] %s20_s24 }
   0x5   :  { %s617_s27 = scalar_lea.hbm %s868_s1, 1024 }
   0x6   :  { %p618_p0 = scmp.ne.s32.totalorder %s868_s1, %s617_s27  ;;  %p621_p1 = scmp.lt.u32.totalorder %s617_s27, %s868_s1 }
   0x8   :  { %p623_p2 = pnand %p621_p1, %p618_p0 }
   0xa   :  { %626 = shalt.err (!%p623_p2)
}
   0xb   :  { %s627_s8 = scalar_lea.vmem %s33_s22, 1024  ;;  %p632_p4 = scmp.lt.s32.totalorder %s33_s22, %s33_s22 }
   0xc   :  { %p628_p3 = scmp.ne.s32.totalorder %s33_s22, %s627_s8  ;;  %p633_p5 = scmp.lt.s32.totalorder %s627_s8, %s627_s8 }
   0xe   :  { %p634_p6 = por %p633_p5, %p632_p4 }
  0x10   :  { %p635_p7 = pnand %p634_p6, %p628_p3 }
  0x12   :  { %638 = shalt.err (!%p635_p7)
}
  0x13   :  { %s737_s9 = smov 64   ;;  %s738_s10 = smov 4  }
  0x14   :  { %38 = dma.hbm_to_vmem [thread:$0]  %s868_s1, 1024, %s33_s22, [#allocation6], %s737_s9, %s737_s9, %s738_s10  }
  0x15   :  { %s639_s15 = scalar_lea.hbm %s867_s0, 128 }
  0x16   :  { %p640_p8 = scmp.ne.s32.totalorder %s867_s0, %s639_s15  ;;  %p643_p9 = scmp.lt.u32.totalorder %s639_s15, %s867_s0 }
  0x18   :  { %p645_p10 = pnand %p643_p9, %p640_p8 }
  0x1a   :  { %648 = shalt.err (!%p645_p10)
}
  0x1b   :  { %s649_s20 = scalar_lea.vmem %s784_s24, 128  ;;  %p654_p12 = scmp.lt.s32.totalorder %s784_s24, %s784_s24 }
  0x1c   :  { %p650_p11 = scmp.ne.s32.totalorder %s784_s24, %s649_s20  ;;  %p655_p13 = scmp.lt.s32.totalorder %s649_s20, %s649_s20 }
  0x1e   :  { %p656_p0 = por %p655_p13, %p654_p12 }
  0x20   :  { %p657_p1 = pnand %p656_p0, %p650_p11 }
  0x22   :  { %660 = shalt.err (!%p657_p1)
}
  0x23   :  { %26 = dma.hbm_to_vmem [thread:$0]  %s867_s0, 128, %s784_s24, [#allocation3], %s737_s9, %s737_s9, %s738_s10  }
  0x24   :  { %s739_s22 = smov [#allocation7]   ;;  %s740_s25 = smov [#allocation8]  }
  0x25   :  { %s45_s23 = sshll.u32 %s739_s22, 4  ;;  %s54_s26 = sshll.u32 %s740_s25, 4  ;;  %s46_s23 = int_to_ptr.vmem [resolvable:$true] %s45_s23  ;;  %s815_s26 = int_to_ptr.vmem [resolvable:$true] %s54_s26 }
  0x26   :  { %s661_s29 = scalar_lea.hbm %s869_s2, 16 }
  0x27   :  { %p662_p2 = scmp.ne.s32.totalorder %s869_s2, %s661_s29  ;;  %p665_p3 = scmp.lt.u32.totalorder %s661_s29, %s869_s2 }
  0x29   :  { %p667_p4 = pnand %p665_p3, %p662_p2 }
  0x2b   :  { %670 = shalt.err (!%p667_p4)
}
  0x2c   :  { %s671_s0 = scalar_lea.vmem %s46_s23, 16  ;;  %s675_s24 = scalar_lea.vmem %s46_s23, 32 }
  0x2d   :  { %p672_p5 = scmp.ne.s32.totalorder %s46_s23, %s671_s0  ;;  %p676_p6 = scmp.lt.s32.totalorder %s46_s23, %s46_s23 }
  0x2e   :  { %p677_p7 = scmp.lt.s32.totalorder %s675_s24, %s671_s0 }
  0x30   :  { %p678_p8 = por %p677_p7, %p676_p6 }
  0x32   :  { %p679_p9 = pnand %p678_p8, %p672_p5 }
  0x34   :  { %682 = shalt.err (!%p679_p9)
}
  0x35   :  { %48 = dma.hbm_to_vmem [thread:$0]  %s869_s2, 16, %s46_s23, [#allocation6]  }
  0x36   :  { %s683_s14 = scalar_lea.hbm %s870_s3, 2048 }
  0x37   :  { %p684_p10 = scmp.ne.s32.totalorder %s870_s3, %s683_s14  ;;  %p687_p11 = scmp.lt.u32.totalorder %s683_s14, %s870_s3 }
  0x39   :  { %p689_p12 = pnand %p687_p11, %p684_p10 }
  0x3b   :  { %692 = shalt.err (!%p689_p12)
}
  0x3c   :  { %s693_s19 = scalar_lea.vmem %s815_s26, 2048  ;;  %p698_p0 = scmp.lt.s32.totalorder %s815_s26, %s815_s26 }
  0x3d   :  { %p694_p13 = scmp.ne.s32.totalorder %s815_s26, %s693_s19  ;;  %p699_p1 = scmp.lt.s32.totalorder %s693_s19, %s693_s19 }
  0x3f   :  { %p700_p2 = por %p699_p1, %p698_p0 }
  0x41   :  { %p701_p3 = pnand %p700_p2, %p694_p13 }
  0x43   :  { %704 = shalt.err (!%p701_p3)
}
  0x44   :  { %s741_s2 = smov 128   ;;  %s742_s20 = smov 8  }
  0x45   :  { %60 = dma.hbm_to_vmem [thread:$0]  %s870_s3, 2048, %s815_s26, [#allocation9], %s741_s2, %s741_s2, %s742_s20  }
  0x46   :  { %727 = dma.done.wait [#allocation3], 128  }
  0x47   :  { %728 = vsyncadd [#allocation3], 4294967168 }
  0x48   :  { %729 = dma.done.wait [#allocation6], 1040  }
  0x49   :  { %730 = vsyncadd [#allocation6], 4294966256 }
  0x4a   :  { %731 = dma.done.wait [#allocation9], 2048  }
  0x4b   :  { %732 = vsyncadd [#allocation9], 4294965248  ;;  %v743_v0 = vmov 0.0   ;;  %vm744_vm0 = vmmov 0   ;;  %v544_v1 = vld [vmem:[#allocation5] sm:$0xff]   ;;  %v545_v2 = vld [vmem:[#allocation5 + $0x8] sm:$0xff]   ;;  %v219_v37 = vlaneseq }
  0x4c   :  { %510 = vmatprep.subr.bf16.mxu0 %v743_v0  ;;  %526 = vmatprep.mubr.msk.bf16.mxu0 %vm744_vm0, %v743_v0  ;;  %v546_v3 = vld [vmem:[#allocation5 + $0x10] sm:$0xff]   ;;  %v547_v4 = vld [vmem:[#allocation5 + $0x18] sm:$0xff]   ;;  %v555_v6 = vld [vmem:[#allocation8] ss:$8 sps:$4 sm:$0xff]   ;;  %v745_v26 = vmov 0  }
  0x4d   :  { %511 = vmatpush3.bf16.msra.mxu0 %v544_v1  ;;  %v553_v5 = vld [vmem:[#allocation8 + $0x4] ss:$8 sps:$4 sm:$0xff]   ;;  %v556_v7 = vld [vmem:[#allocation8 + $0x14] ss:$8 sps:$4 sm:$0xff]   ;;  %v558_v8 = vld [vmem:[#allocation8 + $0x10] ss:$8 sps:$4 sm:$0xff]   ;;  %341 = vmatprep.mubr.bf16.mxu1 %v745_v26 }
  0x4e   :  { %512 = vmatprep.subr.bf16.mxu0 %v743_v0  ;;  %309 = vmatprep.subr.bf16.mxu1 %v553_v5  ;;  %v559_v9 = vld [vmem:[#allocation8 + $0x24] ss:$8 sps:$4 sm:$0xff]   ;;  %v561_v11 = vld [vmem:[#allocation8 + $0x20] ss:$8 sps:$4 sm:$0xff]   ;;  %v562_v12 = vld [vmem:[#allocation8 + $0x34] ss:$8 sps:$4 sm:$0xff]  }
  0x4f   :  { %310 = vmatpush1.bf16.msra.mxu1 %v555_v6  ;;  %v548_v10 = vld [vmem:[#allocation5 + $0x20] sm:$0xff]   ;;  %v549_v13 = vld [vmem:[#allocation5 + $0x28] sm:$0xff]   ;;  %v564_v14 = vld [vmem:[#allocation8 + $0x30] ss:$8 sps:$4 sm:$0xff]   ;;  %v220_v38 = vshrl.u32 %v219_v37, 7 }
  0x50   :  { %311 = vmatprep.subr.bf16.mxu1 %v556_v7  ;;  %v565_v15 = vld [vmem:[#allocation8 + $0x44] ss:$8 sps:$4 sm:$0xff]   ;;  %v567_v17 = vld [vmem:[#allocation8 + $0x40] ss:$8 sps:$4 sm:$0xff]   ;;  %v568_v18 = vld [vmem:[#allocation8 + $0x54] ss:$8 sps:$4 sm:$0xff]  }
  0x51   :  { %513 = vmatpush3.bf16.msra.mxu0 %v545_v2  ;;  %v550_v16 = vld [vmem:[#allocation5 + $0x30] sm:$0xff]   ;;  %v551_v19 = vld [vmem:[#allocation5 + $0x38] sm:$0xff]   ;;  %v573_v23 = vld [vmem:[#allocation8 + $0x60] ss:$8 sps:$4 sm:$0xff]   ;;  %v221_v39 = vsub.s32 0, %v220_v38  ;;  %v225_v41 = vsub.s32 1, %v220_v38 }
  0x52   :  { %514 = vmatprep.subr.bf16.mxu0 %v743_v0  ;;  %v570_v20 = vld [vmem:[#allocation8 + $0x50] ss:$8 sps:$4 sm:$0xff]   ;;  %v571_v22 = vld [vmem:[#allocation8 + $0x64] ss:$8 sps:$4 sm:$0xff]   ;;  %v574_v24 = vld [vmem:[#allocation8 + $0x74] ss:$8 sps:$4 sm:$0xff]  }
  0x53   :  { %312 = vmatpush1.bf16.msra.mxu1 %v558_v8  ;;  %v552_v21 = vld [vmem:[#allocation2] sm:$0xff]   ;;  %v471_v27 = vld [vmem:[#allocation7] ss:$0 sm:$0xff]  ;;  %v79_v40 = vld [vmem:[%s871_s4] sm:$0x3] }
  0x54   :  { %313 = vmatprep.subr.bf16.mxu1 %v559_v9  ;;  %v576_v25 = vld [vmem:[#allocation8 + $0x70] ss:$8 sps:$4 sm:$0xff]   ;;  %v222_v42 = vrot.slane %v79_v40, %v221_v39  ;;  %v226_v43 = vrot.slane %v79_v40, %v225_v41  ;;  %v406_v63 = vld [vmem:[%s872_s5] sm:$0xff] }
  0x55   :  { %515 = vmatpush3.bf16.msra.mxu0 %v546_v3  ;;  %v408_v1 = vmax.f32 %v406_v63, 1e-06  ;;  %v407_v2 = vld [vmem:[%s872_s5 + $0x8] sm:$0xff]  ;;  %s746_s5 = smov [#allocation10]  }
  0x56   :  { %516 = vmatprep.subr.bf16.mxu0 %v743_v0  ;;  %s457_s27 = sshll.u32 %s746_s5, 4  ;;  %s458_s27 = int_to_ptr.vmem [resolvable:$true] %s457_s27 }
  0x57   :  { %314 = vmatpush1.bf16.msra.mxu1 %v561_v11  ;;  %v410_v3 = vmin.f32 %v408_v1, 0.999999  ;;  %s705_s28 = scalar_lea.vmem %s458_s27, 768  ;;  %p710_p5 = scmp.lt.s32.totalorder %s458_s27, %s458_s27 }
  0x58   :  { %315 = vmatprep.subr.bf16.mxu1 %v562_v12  ;;  %p706_p4 = scmp.ne.s32.totalorder %s458_s27, %s705_s28  ;;  %p711_p6 = scmp.lt.s32.totalorder %s705_s28, %s705_s28 }
  0x59   :  { %517 = vmatpush3.bf16.msra.mxu0 %v547_v4  ;;  %v409_v4 = vmax.f32 %v407_v2, 1e-06 }
  0x5a   :  { %518 = vmatprep.subr.bf16.mxu0 %v743_v0  ;;  %p712_p7 = por %p711_p6, %p710_p5 }
  0x5b   :  { %316 = vmatpush1.bf16.msra.mxu1 %v564_v14  ;;  %v411_v14 = vmin.f32 %v409_v4, 0.999999 }
  0x5c   :  { %317 = vmatprep.subr.bf16.mxu1 %v565_v15  ;;  %p713_p8 = pnand %p712_p7, %p706_p4 }
  0x5d   :  { %519 = vmatpush3.bf16.msra.mxu0 %v548_v10  ;;  %v412_v10 = vsub.f32 1.0, %v410_v3 }
  0x5e   :  { %520 = vmatprep.subr.bf16.mxu0 %v743_v0 }
  0x5f   :  { %318 = vmatpush1.bf16.msra.mxu1 %v567_v17 }
  0x60   :  { %319 = vmatprep.subr.bf16.mxu1 %v568_v18 }
  0x61   :  { %521 = vmatpush3.bf16.msra.mxu0 %v549_v13 }
  0x62   :  { %522 = vmatprep.subr.bf16.mxu0 %v743_v0 }
  0x63   :  { %320 = vmatpush1.bf16.msra.mxu1 %v570_v20 }
  0x64   :  { %321 = vmatprep.subr.bf16.mxu1 %v571_v22 }
  0x65   :  { %523 = vmatpush3.bf16.msra.mxu0 %v550_v16 }
  0x66   :  { %524 = vmatprep.subr.bf16.mxu0 %v743_v0 }
  0x67   :  { %322 = vmatpush1.bf16.msra.mxu1 %v573_v23 }
  0x68   :  { %323 = vmatprep.subr.bf16.mxu1 %v574_v24 }
  0x69   :  { %525 = vmatpush3.bf16.msra.mxu0 %v551_v19 }
  0x6b   :  { %324 = vmatpush1.bf16.msra.mxu1 %v576_v25 }
  0x6c   :  { %527 = vmatmul.mubr.bf16.vlgmr.msra.gmra.mrb[0].mxu0 %v552_v21  ;;  %v413_v21 = vsub.f32 1.0, %v411_v14 }
 0x13f   :  { %v192_v28 = vpop.f32.mrb[0].mxu0 }
 0x140   :  { %v193_v29 = vadd.f32 %v471_v27, %v192_v28  ;;  %v528_v30 = vpop.f32.mrb[1].mxu0 }
 0x141   :  { %v195_v31 = vpop.f32.mrb[2].mxu0 }
 0x142   :  { %v196_v32 = vadd.f32 %v471_v27, %v195_v31  ;;  %v529_v33 = vpop.f32.mrb[3].mxu0  ;;  %v199_v34 = vmax.f32 %v193_v29, 0.0 }
 0x144   :  { %v200_v35 = vmax.f32 %v196_v32, 0.0 }
 0x146   :  { %v201_v36 = vpack.c.bf16 %v200_v35, %v199_v34 }
 0x148   :  { %342 = vmatmul.mubr.bf16.vlgmr.msra.gmra.mrb[0].mxu1 %v201_v36 }
 0x21b   :  { %v343_v44 = vpop.f32.mrb[0].mxu1 }
 0x21c   :  { %v344_v45 = vadd.f32 %v343_v44, %v222_v42  ;;  %v345_v46 = vpop.f32.mrb[1].mxu1 }
 0x21d   :  { %v346_v47 = vadd.f32 %v345_v46, %v226_v43  ;;  %v347_v48 = vpop.f32.mrb[2].mxu1 }
 0x21e   :  { %v497_v49 = vmul.f32 -1.442695, %v344_v45  ;;  %v348_v50 = vadd.f32 %v347_v48, %v222_v42  ;;  %v349_v51 = vpop.f32.mrb[3].mxu1 }
 0x21f   :  { %v499_v52 = vmul.f32 -1.442695, %v346_v47  ;;  %v350_v53 = vadd.f32 %v349_v51, %v226_v43 }
 0x220   :  { %577 = vpow2.f32 %v497_v49  ;;  %v498_v54 = vmul.f32 -1.442695, %v348_v50 }
 0x221   :  { %579 = vpow2.f32 %v499_v52  ;;  %v500_v55 = vmul.f32 -1.442695, %v350_v53 }
 0x222   :  { %581 = vpow2.f32 %v498_v54 }
 0x223   :  { %583 = vpow2.f32 %v500_v55 }
 0x22a   :  { %v578_v56 = vpop.eup %577 }
 0x22b   :  { %v580_v57 = vpop.eup %579  ;;  %v358_v58 = vadd.f32 1.0, %v578_v56 }
 0x22c   :  { %v582_v59 = vpop.eup %581  ;;  %v374_v60 = vadd.f32 1.0, %v580_v57 }
 0x22d   :  { %v584_v61 = vpop.eup %583  ;;  %585 = vrcp.f32 %v358_v58  ;;  %v359_v62 = vadd.f32 1.0, %v582_v59 }
 0x22e   :  { %587 = vrcp.f32 %v374_v60  ;;  %v375_v0 = vadd.f32 1.0, %v584_v61 }
 0x22f   :  { %589 = vrcp.f32 %v359_v62 }
 0x230   :  { %591 = vrcp.f32 %v375_v0 }
 0x237   :  { %v586_v5 = vpop.eup %585 }
 0x238   :  { %v588_v6 = vpop.eup %587  ;;  %v364_v7 = vmul.f32 0.8, %v586_v5 }
 0x239   :  { %v590_v8 = vpop.eup %589  ;;  %v380_v9 = vmul.f32 5.0, %v588_v6 }
 0x23a   :  { %v592_v11 = vpop.eup %591  ;;  %v366_v12 = vadd.f32 0.1, %v364_v7  ;;  %v365_v13 = vmul.f32 0.8, %v590_v8 }
 0x23b   :  { %v382_v15 = vadd.f32 1.0, %v380_v9  ;;  %v381_v16 = vmul.f32 5.0, %v592_v11 }
 0x23c   :  { %v384_v17 = vsub.f32 1.0, %v366_v12  ;;  %593 = vrcp.f32 %v366_v12  ;;  %447 = vst [vmem:[#allocation10 + $0x8] sm:$0xff] %v366_v12  ;;  %v367_v18 = vadd.f32 0.1, %v365_v13 }
 0x23d   :  { %595 = vlog2.f32 %v412_v10  ;;  %448 = vst [vmem:[#allocation10 + $0x10] sm:$0xff] %v382_v15  ;;  %v383_v19 = vadd.f32 1.0, %v381_v16 }
 0x23e   :  { %597 = vrcp.f32 %v384_v17  ;;  %v385_v20 = vsub.f32 1.0, %v367_v18  ;;  %450 = vst [vmem:[#allocation10 + $0x20] sm:$0xff] %v367_v18 }
 0x23f   :  { %599 = vrcp.f32 %v367_v18  ;;  %451 = vst [vmem:[#allocation10 + $0x28] sm:$0xff] %v383_v19 }
 0x240   :  { %601 = vrcp.f32 %v385_v20 }
 0x241   :  { %603 = vlog2.f32 %v413_v21 }
 0x246   :  { %v594_v22 = vpop.eup %593 }
 0x247   :  { %v596_v23 = vpop.eup %595  ;;  %v388_v24 = vmul.f32 %v594_v22, %v366_v12 }
 0x248   :  { %v598_v25 = vpop.eup %597  ;;  %v415_v38 = vmul.f32 0.6931472, %v596_v23 }
 0x249   :  { %v600_v26 = vpop.eup %599  ;;  %v390_v27 = vsub.f32 2.0, %v388_v24  ;;  %v396_v28 = vmul.f32 %v598_v25, %v384_v17 }
 0x24a   :  { %v602_v29 = vpop.eup %601  ;;  %v389_v30 = vmul.f32 %v600_v26, %v367_v18 }
 0x24b   :  { %v392_v31 = vmul.f32 %v594_v22, %v390_v27  ;;  %v398_v32 = vsub.f32 2.0, %v396_v28  ;;  %v397_v33 = vmul.f32 %v602_v29, %v385_v20  ;;  %v604_v34 = vpop.eup %603 }
 0x24c   :  { %v391_v35 = vsub.f32 2.0, %v389_v30  ;;  %v417_v43 = vmul.f32 0.6931472, %v604_v34 }
 0x24d   :  { %v400_v36 = vmul.f32 %v598_v25, %v398_v32  ;;  %v402_v37 = vmul.f32 %v392_v31, %v382_v15  ;;  %v399_v39 = vsub.f32 2.0, %v397_v33 }
 0x24e   :  { %v393_v40 = vmul.f32 %v600_v26, %v391_v35 }
 0x24f   :  { %v404_v41 = vmul.f32 %v400_v36, %v382_v15  ;;  %v401_v42 = vmul.f32 %v602_v29, %v399_v39 }
 0x250   :  { %v403_v44 = vmul.f32 %v393_v40, %v383_v19 }
 0x251   :  { %v418_v45 = vmul.f32 %v415_v38, %v404_v41  ;;  %v405_v46 = vmul.f32 %v401_v42, %v383_v19 }
 0x253   :  { %v420_v47 = vmul.f32 1.442695, %v418_v45  ;;  %v419_v48 = vmul.f32 %v417_v43, %v405_v46 }
 0x255   :  { %605 = vpow2.f32 %v420_v47  ;;  %v422_v49 = vmul.f32 1.442695, %v419_v48 }
 0x257   :  { %607 = vpow2.f32 %v422_v49 }
 0x25f   :  { %v606_v50 = vpop.eup %605 }
 0x260   :  { %v424_v51 = vsub.f32 1.0, %v606_v50 }
 0x261   :  { %v608_v52 = vpop.eup %607 }
 0x262   :  { %v426_v53 = vmax.f32 %v424_v51, 1e-38  ;;  %v425_v54 = vsub.f32 1.0, %v608_v52 }
 0x264   :  { %609 = vlog2.f32 %v426_v53  ;;  %v427_v55 = vmax.f32 %v425_v54, 1e-38 }
 0x266   :  { %611 = vlog2.f32 %v427_v55 }
 0x26e   :  { %v610_v56 = vpop.eup %609 }
 0x26f   :  { %v429_v57 = vmul.f32 0.6931472, %v610_v56 }
 0x270   :  { %v612_v58 = vpop.eup %611 }
 0x271   :  { %v432_v59 = vmul.f32 %v429_v57, %v402_v37  ;;  %v431_v60 = vmul.f32 0.6931472, %v612_v58 }
 0x273   :  { %v434_v61 = vmul.f32 1.442695, %v432_v59  ;;  %v433_v62 = vmul.f32 %v431_v60, %v403_v44 }
 0x275   :  { %613 = vpow2.f32 %v434_v61  ;;  %v436_v63 = vmul.f32 1.442695, %v433_v62 }
 0x277   :  { %615 = vpow2.f32 %v436_v63 }
 0x27f   :  { %v614_v0 = vpop.eup %613 }
 0x280   :  { %v438_v1 = vmul.f32 1.2, %v614_v0 }
 0x281   :  { %v616_v2 = vpop.eup %615 }
 0x282   :  { %v440_v3 = vadd.f32 -0.1, %v438_v1  ;;  %v439_v4 = vmul.f32 1.2, %v616_v2 }
 0x284   :  { %v442_v5 = vmax.f32 %v440_v3, 0.0  ;;  %v441_v6 = vadd.f32 -0.1, %v439_v4 }
 0x286   :  { %v444_v7 = vmin.f32 %v442_v5, 1.0  ;;  %v443_v8 = vmax.f32 %v441_v6, 0.0 }
 0x288   :  { %446 = vst [vmem:[#allocation10] sm:$0xff] %v444_v7  ;;  %v445_v9 = vmin.f32 %v443_v8, 1.0 }
 0x28a   :  { %449 = vst [vmem:[#allocation10 + $0x18] sm:$0xff] %v445_v9 }
 0x28b   :  { %716 = shalt.err (!%p713_p8)
}
 0x28c   :  { %s717_s7 = scalar_lea.hbm %s873_s6, 768 }
 0x28d   :  { %p718_p9 = scmp.ne.s32.totalorder %s873_s6, %s717_s7  ;;  %p721_p10 = scmp.lt.u32.totalorder %s717_s7, %s873_s6 }
 0x28f   :  { %p723_p11 = pnand %p721_p10, %p718_p9 }
 0x291   :  { %726 = shalt.err (!%p723_p11)
}
 0x292   :  { %s747_s9 = smov 384   ;;  %s748_s10 = smov 24  }
 0x293   :  { %463 = dma.vmem_to_hbm [thread:$0]  %s458_s27, 768, %s873_s6, [#allocation4], %s747_s9, %s747_s9, %s748_s10  }
 0x294   :  { %733 = dma.done.wait [#allocation4], 768  }
 0x295   :  { %734 = vsyncadd [#allocation4], 4294966528 }
 0x296   :  { %467 = vsyncpa [#allocation3], 1 }
 0x297   :  { %468 = vsyncpa [#allocation6], 1 }
 0x298   :  { %469 = vsyncpa [#allocation9], 1 }
 0x299   :  { %470 = vsyncpa [#allocation4], 1 }

</bundles_post_ra>
